<compile_context>
chip_gen: v5e
topology: v5e:2x2
jax: 0.10.0
libtpu: 0.0.40
codegen_flags: <defaults>
</compile_context>

<pallas_src>
import functools

import jax
import jax.numpy as jnp
from jax.experimental import pallas as pl
from jax.experimental.pallas import tpu as pltpu

BN_EPS = 1e-5
LEAKY_SLOPE = 0.2


def _round_up(x, m):
    return (x + m - 1) // m * m


def _mla_fused_kernel(xt_ref, xv_ref, w1t_ref, w1v_ref, g_ref, be_ref,
                      w2_ref, bc_ref, out_ref, *, inv_n):
    """Fused block-diagonal heads + BN(train) + LeakyReLU + classifier.

    xt/xv arrive unpadded f32; weights arrive pre-padded bf16.  Text head
    activations occupy lanes [0, L), visual head lanes [Lp, Lp+L); the padded
    lanes have gamma = beta = 0 and zero classifier rows, so they contribute
    exactly nothing.
    """
    # Head matmuls (MXU, bf16 operands, f32 accumulation).  Summing the two
    # zero-extended dots is the block-diagonal weight without any concat.
    h = jnp.dot(xt_ref[...].astype(jnp.bfloat16), w1t_ref[...],
                preferred_element_type=jnp.float32)
    h += jnp.dot(xv_ref[...].astype(jnp.bfloat16), w1v_ref[...],
                 preferred_element_type=jnp.float32)                # [B, 2*Lp] f32

    # Training-mode BatchNorm1d, biased variance, two-pass (centered) form.
    mu = jnp.sum(h, axis=0, keepdims=True) * inv_n                  # [1, 2*Lp]
    hc = h - mu
    var = jnp.sum(hc * hc, axis=0, keepdims=True) * inv_n
    scale = g_ref[...] * jax.lax.rsqrt(var + BN_EPS)                # gamma folded in
    hn = hc * scale + be_ref[...]

    # LeakyReLU(0.2) in f32; cast to bf16 only for the classifier MXU feed.
    act = jnp.where(hn >= 0, hn, LEAKY_SLOPE * hn).astype(jnp.bfloat16)

    # Classifier: single matmul, lane-dense f32 output.
    out_ref[...] = jnp.dot(act, w2_ref[...],
                           preferred_element_type=jnp.float32) + bc_ref[...]


def prepare_params(params):
    """One-time parameter prep (call ONCE, outside the per-step path).

    Builds zero-extended bf16 head weights (text -> lanes [0,L), visual ->
    lanes [Lp, Lp+L)), concatenated BN gamma/beta, the stacked classifier
    weight and the padded classifier bias.  The pre-BN Linear biases (bt/bv)
    are intentionally dropped: training-mode BN subtracts the batch mean, so
    a per-feature constant bias cancels exactly.
    """
    Ht, L = params["wt"].shape
    Hv = params["wv"].shape[0]
    C = params["bc"].shape[-1]
    Lp = _round_up(L, 128)
    Cp = _round_up(C, 128)
    L2 = 2 * Lp

    w1t = jnp.zeros((Ht, L2), jnp.float32).at[:, :L].set(params["wt"]).astype(jnp.bfloat16)
    w1v = jnp.zeros((Hv, L2), jnp.float32).at[:, Lp:Lp + L].set(params["wv"]).astype(jnp.bfloat16)
    gamma = (jnp.zeros((1, L2), jnp.float32)
             .at[:, :L].set(params["gt"]).at[:, Lp:Lp + L].set(params["gv"]))
    beta = (jnp.zeros((1, L2), jnp.float32)
            .at[:, :L].set(params["bet"]).at[:, Lp:Lp + L].set(params["bev"]))
    w2 = (jnp.zeros((L2, Cp), jnp.float32)
          .at[:L, :C].set(params["wct"]).at[Lp:Lp + L, :C].set(params["wcv"])
          .astype(jnp.bfloat16))
    bc = jnp.zeros((1, Cp), jnp.float32).at[:, :C].set(params["bc"])

    return {"w1t": w1t, "w1v": w1v, "gamma": gamma, "beta": beta, "w2": w2, "bc": bc}


def mla_forward(text_hidden, image_hidden, prepped, label_size):
    """Per-call path: one pallas_call + one lane slice.  No activation padding."""
    B, Ht = text_hidden.shape
    Bv, Hv = image_hidden.shape
    assert Bv == B and B > 1, "training-mode BatchNorm1d needs batch > 1"
    L2 = prepped["gamma"].shape[-1]      # 2 * Lp
    Cp = prepped["bc"].shape[-1]

    operands = (text_hidden, image_hidden, prepped["w1t"], prepped["w1v"],
                prepped["gamma"], prepped["beta"], prepped["w2"], prepped["bc"])
    out_bytes = B * Cp * 4
    total_bytes = sum(int(a.size) * a.dtype.itemsize for a in operands) + out_bytes
    # Gridless full-array call: no pipelining double-buffer factor; size the
    # scoped VMEM reservation to the real working set + small margin.
    vmem_limit = int(total_bytes + (8 << 20))

    flops = 2 * B * (Ht + Hv) * L2 + 2 * B * L2 * Cp + 10 * B * L2
    cost = pl.CostEstimate(flops=int(flops), transcendentals=int(L2),
                           bytes_accessed=int(total_bytes))

    out = pl.pallas_call(
        functools.partial(_mla_fused_kernel, inv_n=1.0 / B),
        out_shape=jax.ShapeDtypeStruct((B, Cp), jnp.float32),
        in_specs=[pl.BlockSpec(memory_space=pltpu.MemorySpace.VMEM)] * len(operands),
        out_specs=pl.BlockSpec(memory_space=pltpu.MemorySpace.VMEM),
        compiler_params=pltpu.CompilerParams(vmem_limit_bytes=vmem_limit),
        cost_estimate=cost,
    )(*operands)
    return out[:, :label_size]


def reference_forward(text_hidden, image_hidden, p):
    """Pure-JAX f32 reference reproducing the PyTorch training-mode forward."""
    def head(x, w, b, gamma, beta):
        h = x @ w + b
        mu = jnp.mean(h, axis=0, keepdims=True)
        var = jnp.mean((h - mu) ** 2, axis=0, keepdims=True)
        hn = (h - mu) / jnp.sqrt(var + BN_EPS) * gamma + beta
        return jnp.where(hn >= 0, hn, LEAKY_SLOPE * hn)
    a_t = head(text_hidden, p["wt"], p["bt"], p["gt"], p["bet"])
    a_v = head(image_hidden, p["wv"], p["bv"], p["gv"], p["bev"])
    return a_t @ p["wct"] + a_v @ p["wcv"] + p["bc"]


def make_params(key, hidden_text, hidden_vis, linear_injection, label_size):
    ks = jax.random.split(key, 8)
    scale = 0.05
    return {
        # textual_transformer_linear: Linear(hidden_text, L) + BN(L)
        "wt":  scale * jax.random.normal(ks[0], (hidden_text, linear_injection), jnp.float32),
        "bt":  scale * jax.random.normal(ks[1], (1, linear_injection), jnp.float32),
        "gt":  jnp.ones((1, linear_injection), jnp.float32),
        "bet": jnp.zeros((1, linear_injection), jnp.float32),
        # visual_transformer_linear: Linear(hidden_vis, L) + BN(L)
        "wv":  scale * jax.random.normal(ks[2], (hidden_vis, linear_injection), jnp.float32),
        "bv":  scale * jax.random.normal(ks[3], (1, linear_injection), jnp.float32),
        "gv":  jnp.ones((1, linear_injection), jnp.float32),
        "bev": jnp.zeros((1, linear_injection), jnp.float32),
        # classifier: Linear(2L, label_size), kept as text / visual halves
        "wct": scale * jax.random.normal(ks[4], (linear_injection, label_size), jnp.float32),
        "wcv": scale * jax.random.normal(ks[5], (linear_injection, label_size), jnp.float32),
        "bc":  scale * jax.random.normal(ks[6], (1, label_size), jnp.float32),
    }


if __name__ == "__main__":
    # Small, self-consistent shapes.  B is deliberately NOT a multiple of 8 and
    # the hidden sizes are not multiples of 128: full-array blocks handle both,
    # and BN stats are computed over exactly B rows (no batch padding needed).
    B = 6
    HIDDEN_TEXT = 32      # tmpt_textual_model.hidden_size
    HIDDEN_VIS = 32       # tmpt_visual_model.hidden_size
    LINEAR_INJ = 32       # linear_injection = min(hidden_text, hidden_vis)
    LABEL_SIZE = 8        # args.label_size

    key = jax.random.PRNGKey(0)
    k_xt, k_xv, k_p = jax.random.split(key, 3)

    # Stand-ins for the encoder outputs: pooled last_hidden_state [B, hidden].
    text_hidden = jax.random.normal(k_xt, (B, HIDDEN_TEXT), jnp.float32)
    image_hidden = jax.random.normal(k_xv, (B, HIDDEN_VIS), jnp.float32)

    params = make_params(k_p, HIDDEN_TEXT, HIDDEN_VIS, LINEAR_INJ, LABEL_SIZE)

    # One-time parameter prep (off the per-call path).
    prepped = jax.block_until_ready(prepare_params(params))

    logits = jax.block_until_ready(
        mla_forward(text_hidden, image_hidden, prepped, LABEL_SIZE))
    ref = reference_forward(text_hidden, image_hidden, params)

    assert logits.shape == (B, LABEL_SIZE), logits.shape
    max_err = float(jnp.max(jnp.abs(logits - ref)))
    # bf16 MXU operands vs f32 reference -> relaxed tolerance.
    assert jnp.allclose(logits, ref, atol=5e-2, rtol=5e-2), (
        f"mismatch vs reference, max abs err = {max_err}")
    print("KERNEL_OK")
</pallas_src>

<mosaic_0001>
module attributes {stable_mosaic.version = 11 : i64} {
  func.func @_mla_fused_kernel(%arg0: memref<6x32xf32, #tpu.memory_space<vmem>>, %arg1: memref<6x32xf32, #tpu.memory_space<vmem>>, %arg2: memref<32x256xbf16, #tpu.memory_space<vmem>>, %arg3: memref<32x256xbf16, #tpu.memory_space<vmem>>, %arg4: memref<1x256xf32, #tpu.memory_space<vmem>>, %arg5: memref<1x256xf32, #tpu.memory_space<vmem>>, %arg6: memref<256x128xbf16, #tpu.memory_space<vmem>>, %arg7: memref<1x128xf32, #tpu.memory_space<vmem>>, %arg8: memref<6x128xf32, #tpu.memory_space<vmem>>) attributes {dimension_semantics = [], scalar_prefetch = 0 : i64, scratch_operands = 0 : i64, tpu.core_type = #tpu.core_type<tc>} {
    %c0 = arith.constant 0 : index
    %c0_0 = arith.constant 0 : index
    %0 = vector.load %arg0[%c0, %c0_0] : memref<6x32xf32, #tpu.memory_space<vmem>>, vector<6x32xf32>
    %1 = arith.truncf %0 : vector<6x32xf32> to vector<6x32xbf16>
    %c0_1 = arith.constant 0 : index
    %c0_2 = arith.constant 0 : index
    %2 = vector.load %arg2[%c0_1, %c0_2] : memref<32x256xbf16, #tpu.memory_space<vmem>>, vector<32x256xbf16>
    %cst = arith.constant dense<0.000000e+00> : vector<6x256xf32>
    %3 = tpu.matmul %1, %2, %cst {dimension_numbers = #tpu.dot_dimension_numbers<[1], [0], [0], [1], [0, 0, 1, 1], [], []>} : vector<6x32xbf16>, vector<32x256xbf16>, vector<6x256xf32> -> vector<6x256xf32>
    %c0_3 = arith.constant 0 : index
    %c0_4 = arith.constant 0 : index
    %4 = vector.load %arg1[%c0_3, %c0_4] : memref<6x32xf32, #tpu.memory_space<vmem>>, vector<6x32xf32>
    %5 = arith.truncf %4 : vector<6x32xf32> to vector<6x32xbf16>
    %c0_5 = arith.constant 0 : index
    %c0_6 = arith.constant 0 : index
    %6 = vector.load %arg3[%c0_5, %c0_6] : memref<32x256xbf16, #tpu.memory_space<vmem>>, vector<32x256xbf16>
    %cst_7 = arith.constant dense<0.000000e+00> : vector<6x256xf32>
    %7 = tpu.matmul %5, %6, %cst_7 {dimension_numbers = #tpu.dot_dimension_numbers<[1], [0], [0], [1], [0, 0, 1, 1], [], []>} : vector<6x32xbf16>, vector<32x256xbf16>, vector<6x256xf32> -> vector<6x256xf32>
    %8 = arith.addf %3, %7 : vector<6x256xf32>
    %cst_8 = arith.constant dense<0.000000e+00> : vector<256xf32>
    %9 = vector.multi_reduction <add>, %8, %cst_8 [0] : vector<6x256xf32> to vector<256xf32>
    %10 = vector.shape_cast %9 : vector<256xf32> to vector<1x256xf32>
    %cst_9 = arith.constant 0.166666672 : f32
    %11 = vector.broadcast %cst_9 : f32 to vector<1x256xf32>
    %12 = arith.mulf %10, %11 : vector<1x256xf32>
    %13 = vector.broadcast %12 : vector<1x256xf32> to vector<6x256xf32>
    %14 = arith.subf %8, %13 : vector<6x256xf32>
    %15 = arith.mulf %14, %14 : vector<6x256xf32>
    %cst_10 = arith.constant dense<0.000000e+00> : vector<256xf32>
    %16 = vector.multi_reduction <add>, %15, %cst_10 [0] : vector<6x256xf32> to vector<256xf32>
    %17 = vector.shape_cast %16 : vector<256xf32> to vector<1x256xf32>
    %cst_11 = arith.constant 0.166666672 : f32
    %18 = vector.broadcast %cst_11 : f32 to vector<1x256xf32>
    %19 = arith.mulf %17, %18 : vector<1x256xf32>
    %c0_12 = arith.constant 0 : index
    %c0_13 = arith.constant 0 : index
    %20 = vector.load %arg4[%c0_12, %c0_13] : memref<1x256xf32, #tpu.memory_space<vmem>>, vector<1x256xf32>
    %cst_14 = arith.constant 9.99999974E-6 : f32
    %21 = vector.broadcast %cst_14 : f32 to vector<1x256xf32>
    %22 = arith.addf %19, %21 : vector<1x256xf32>
    %23 = math.rsqrt %22 : vector<1x256xf32>
    %24 = arith.mulf %20, %23 : vector<1x256xf32>
    %25 = vector.broadcast %24 : vector<1x256xf32> to vector<6x256xf32>
    %26 = arith.mulf %14, %25 : vector<6x256xf32>
    %c0_15 = arith.constant 0 : index
    %c0_16 = arith.constant 0 : index
    %27 = vector.load %arg5[%c0_15, %c0_16] : memref<1x256xf32, #tpu.memory_space<vmem>>, vector<1x256xf32>
    %28 = vector.broadcast %27 : vector<1x256xf32> to vector<6x256xf32>
    %29 = arith.addf %26, %28 : vector<6x256xf32>
    %cst_17 = arith.constant 0.000000e+00 : f32
    %30 = vector.broadcast %cst_17 : f32 to vector<6x256xf32>
    %31 = arith.cmpf oge, %29, %30 : vector<6x256xf32>
    %cst_18 = arith.constant 2.000000e-01 : f32
    %32 = vector.broadcast %cst_18 : f32 to vector<6x256xf32>
    %33 = arith.mulf %32, %29 : vector<6x256xf32>
    %34 = arith.select %31, %29, %33 : vector<6x256xi1>, vector<6x256xf32>
    %35 = arith.truncf %34 : vector<6x256xf32> to vector<6x256xbf16>
    %c0_19 = arith.constant 0 : index
    %c0_20 = arith.constant 0 : index
    %36 = vector.load %arg6[%c0_19, %c0_20] : memref<256x128xbf16, #tpu.memory_space<vmem>>, vector<256x128xbf16>
    %cst_21 = arith.constant dense<0.000000e+00> : vector<6x128xf32>
    %37 = tpu.matmul %35, %36, %cst_21 {dimension_numbers = #tpu.dot_dimension_numbers<[1], [0], [0], [1], [0, 0, 1, 1], [], []>} : vector<6x256xbf16>, vector<256x128xbf16>, vector<6x128xf32> -> vector<6x128xf32>
    %c0_22 = arith.constant 0 : index
    %c0_23 = arith.constant 0 : index
    %38 = vector.load %arg7[%c0_22, %c0_23] : memref<1x128xf32, #tpu.memory_space<vmem>>, vector<1x128xf32>
    %39 = vector.broadcast %38 : vector<1x128xf32> to vector<6x128xf32>
    %40 = arith.addf %37, %39 : vector<6x128xf32>
    %c0_24 = arith.constant 0 : index
    %c0_25 = arith.constant 0 : index
    %41 = vector.load %arg8[%c0_24, %c0_25] : memref<6x128xf32, #tpu.memory_space<vmem>>, vector<6x128xf32>
    tpu.vector_store %arg8[%c0_24, %c0_25], %40 {strides = array<i32>} : memref<6x128xf32, #tpu.memory_space<vmem>>, vector<6x128xf32>,
    return
  }
}

</mosaic_0001>

<bundles_post_ra>
// kernel: tpu_custom_call.1
= control target key start
LH: loop header
LB: loop body
LE: loop exit
PB: predicated region body
PF: predicated region fallthrough
CT: control target
= control target key end

     0   :  { %13 = vsyncpa [#allocation3], 0  ;;  %s871_s0 = inlined_call_operand.hbm [shape: f32[6,32], index: 0, kind: input, shape index: {}]   ;;  %s872_s1 = inlined_call_operand.hbm [shape: f32[6,32], index: 1, kind: input, shape index: {}]   ;;  %s873_s2 = inlined_call_operand.hbm [shape: bf16[32,256], index: 2, kind: input, shape index: {}]   ;;  %s874_s3 = inlined_call_operand.hbm [shape: bf16[32,256], index: 3, kind: input, shape index: {}]   ;;  %s875_s4 = inlined_call_operand.vmem [shape: f32[1,256], index: 4, kind: input, shape index: {}]   ;;  %s876_s5 = inlined_call_operand.vmem [shape: f32[1,256], index: 5, kind: input, shape index: {}]   ;;  %s877_s6 = inlined_call_operand.hbm [shape: bf16[256,128], index: 6, kind: input, shape index: {}]   ;;  %s878_s7 = inlined_call_operand.vmem [shape: f32[1,128], index: 7, kind: input, shape index: {}]   ;;  %s879_s8 = inlined_call_operand.hbm [shape: f32[6,128], index: 8, kind: output, shape index: {}]  }
   0x1   :  { %14 = vsyncpa [#allocation6], 0 }
   0x2   :  { %15 = vsyncpa [#allocation9], 0  ;;  %s33_s29 = sshll.u32 %s872_s1, 4  ;;  %s34_s29 = int_to_ptr.hbm [resolvable:$true] %s33_s29 }
   0x3   :  { %16 = vsyncpa [#allocation4], 0  ;;  %s775_s30 = smov [#allocation5]   ;;  %s56_s12 = sshll.u32 %s874_s3, 4  ;;  %s57_s12 = int_to_ptr.hbm [resolvable:$true] %s56_s12 }
   0x4   :  { %s35_s9 = sshll.u32 %s775_s30, 4  ;;  %s776_s13 = smov [#allocation8]   ;;  %s36_s9 = int_to_ptr.vmem [resolvable:$true] %s35_s9 }
   0x5   :  { %38 = dma.hbm_to_vmem [thread:$0]  %s34_s29, 128, %s36_s9, [#allocation6]  }
   0x6   :  { %s58_s14 = sshll.u32 %s776_s13, 4  ;;  %s22_s17 = sshll.u32 %s871_s0, 4  ;;  %s59_s14 = int_to_ptr.vmem [resolvable:$true] %s58_s14  ;;  %s23_s17 = int_to_ptr.hbm [resolvable:$true] %s22_s17 }
   0x7   :  { %s777_s1 = smov 128   ;;  %s778_s18 = smov 8  }
   0x8   :  { %64 = dma.hbm_to_vmem [thread:$0]  %s57_s12, 512, %s59_s14, [#allocation9], %s777_s1, %s777_s1, %s778_s18  }
   0x9   :  { %s43_s21 = sshll.u32 %s873_s2, 4  ;;  %s779_s22 = smov [#allocation2]   ;;  %s44_s21 = int_to_ptr.hbm [resolvable:$true] %s43_s21 }
   0xa   :  { %s24_s23 = sshll.u32 %s779_s22, 4  ;;  %s780_s3 = smov [#allocation7]   ;;  %s25_s23 = int_to_ptr.vmem [resolvable:$true] %s24_s23 }
   0xb   :  { %27 = dma.hbm_to_vmem [thread:$0]  %s23_s17, 128, %s25_s23, [#allocation3]  }
   0xc   :  { %s45_s24 = sshll.u32 %s780_s3, 4  ;;  %s73_s0 = sshll.u32 %s877_s6, 4  ;;  %s46_s24 = int_to_ptr.vmem [resolvable:$true] %s45_s24  ;;  %s74_s0 = int_to_ptr.hbm [resolvable:$true] %s73_s0 }
   0xd   :  { %51 = dma.hbm_to_vmem [thread:$0]  %s44_s21, 512, %s46_s24, [#allocation6], %s777_s1, %s777_s1, %s778_s18  }
   0xe   :  { %s781_s27 = smov [#allocation10]   ;;  %s782_s29 = smov 64  }
   0xf   :  { %s75_s28 = sshll.u32 %s781_s27, 4  ;;  %s783_s30 = smov 4   ;;  %s76_s28 = int_to_ptr.vmem [resolvable:$true] %s75_s28 }
  0x10   :  { %81 = dma.hbm_to_vmem [thread:$0]  %s74_s0, 2048, %s76_s28, [#allocation9], %s782_s29, %s782_s29, %s783_s30  }
  0x11   :  { %767 = dma.done.wait [#allocation3], 128  }
  0x12   :  { %768 = vsyncadd [#allocation3], 4294967168 }
  0x13   :  { %769 = dma.done.wait [#allocation6], 640  }
  0x14   :  { %770 = vsyncadd [#allocation6], 4294966656 }
  0x15   :  { %771 = dma.done.wait [#allocation9], 2560  }
  0x16   :  { %772 = vsyncadd [#allocation9], 4294964736  ;;  %v494_v0 = vld [vmem:[#allocation8 + $0x10] sm:$0xf]  ;;  %v591_v1 = vld [vmem:[#allocation8 + $0x14] sm:$0xf0] }
  0x17   :  { %v590_v2 = vld [vmem:[#allocation8 + $0x14] sm:$0xf]  ;;  %v495_v3 = vor.u32 %v591_v1, %v494_v0  ;;  %v496_v4 = vld [vmem:[#allocation8 + $0x18] sm:$0xf0]  ;;  %v486_v5 = vld [vmem:[#allocation8] sm:$0xf] }
  0x18   :  { %v589_v6 = vld [vmem:[#allocation8 + $0x4] sm:$0xf0]  ;;  %v499_v7 = vor.u32 %v590_v2, %v496_v4  ;;  %v588_v8 = vld [vmem:[#allocation8 + $0x4] sm:$0xf]  ;;  %v488_v9 = vld [vmem:[#allocation8 + $0x8] sm:$0xf0] }
  0x19   :  { %v111_v10 = vld [vmem:[#allocation5] sm:$0x3f]  ;;  %147 = vmatpush.bf16.msra.mxu2 %v495_v3  ;;  %v487_v11 = vor.u32 %v589_v6, %v486_v5  ;;  %v586_v12 = vld [vmem:[#allocation7 + $0x14] sm:$0xf]  ;;  %v512_v14 = vld [vmem:[#allocation7 + $0x10] sm:$0xf]  ;;  %v491_v15 = vor.u32 %v588_v8, %v488_v9 }
  0x1a   :  { %v514_v13 = vld [vmem:[#allocation7 + $0x18] sm:$0xf0]  ;;  %160 = vmatpush.bf16.msra.mxu3 %v499_v7  ;;  %v587_v16 = vld [vmem:[#allocation7 + $0x14] sm:$0xf0]  ;;  %v504_v19 = vld [vmem:[#allocation7] sm:$0xf]  ;;  %v112_v21 = vpack.c.bf16 %v111_v10, %v111_v10 }
  0x1b   :  { %v517_v17 = vor.u32 %v586_v12, %v514_v13  ;;  %v513_v18 = vor.u32 %v587_v16, %v512_v14  ;;  %v585_v20 = vld [vmem:[#allocation7 + $0x4] sm:$0xf0]  ;;  %v584_v22 = vld [vmem:[#allocation7 + $0x4] sm:$0xf]  ;;  %v506_v23 = vld [vmem:[#allocation7 + $0x8] sm:$0xf0] }
  0x1c   :  { %vm137_vm0 = vcmask 261120   ;;  %v505_v24 = vor.u32 %v585_v20, %v504_v19  ;;  %v509_v25 = vor.u32 %v584_v22, %v506_v23  ;;  %v105_v26 = vld [vmem:[#allocation2] sm:$0x3f]  ;;  %vm216_vm1 = vcmask 1045504   ;;  %v599_v46 = vld [vmem:[#allocation10 + $0x38] sm:$0xff]  ;;  %v597_v58 = vld [vmem:[#allocation10 + $0x28] sm:$0xff] }
  0x1d   :  { %148 = vmatpush.bf16.msra.mxu2 %v487_v11  ;;  %v106_v27 = vpack.c.bf16 %v105_v26, %v105_v26  ;;  %v607_v47 = vld [vmem:[#allocation10 + $0x78] sm:$0xff]  ;;  %438 = vmatpush.bf16.msra.mxu0 %v599_v46  ;;  %v598_v52 = vld [vmem:[#allocation10 + $0x30] sm:$0xff]  ;;  %v605_v59 = vld [vmem:[#allocation10 + $0x68] sm:$0xff]  ;;  %vm279_vm7 = vcmask 1040384   ;;  %s784_s11 = smov [#allocation11]   ;;  %s472_s15 = sshll.u32 %s879_s8, 4  ;;  %s473_s15 = int_to_ptr.hbm [resolvable:$true] %s472_s15 }
  0x1e   :  { %161 = vmatpush.bf16.msra.mxu3 %v491_v15  ;;  %451 = vmatpush.bf16.msra.mxu1 %v607_v47  ;;  %v606_v53 = vld [vmem:[#allocation10 + $0x70] sm:$0xff]  ;;  %v596_v0 = vld [vmem:[#allocation10 + $0x20] sm:$0xff]  ;;  %v595_v7 = vld [vmem:[#allocation10 + $0x18] sm:$0xff]  ;;  %s470_s12 = sshll.u32 %s784_s11, 4  ;;  %s471_s12 = int_to_ptr.vmem [resolvable:$true] %s470_s12 }
  0x1f   :  { %v604_v1 = vld [vmem:[#allocation10 + $0x60] sm:$0xff]  ;;  %v603_v8 = vld [vmem:[#allocation10 + $0x58] sm:$0xff]  ;;  %v594_v13 = vld [vmem:[#allocation10 + $0x10] sm:$0xff] }
  0x20   :  { %500 = vmatmul.msk.bf16.vlgmr.msra.gmra.mxu2 %vm137_vm0, %v112_v21  ;;  %v602_v14 = vld [vmem:[#allocation10 + $0x50] sm:$0xff]  ;;  %v593_v19 = vld [vmem:[#allocation10 + $0x8] sm:$0xff]  ;;  %v592_v23 = vld [vmem:[#allocation10] sm:$0xff] }
  0x21   :  { %196 = vmatpush.bf16.msrb.mxu2 %v513_v18  ;;  %501 = vmatmul.msk.bf16.vlgmr.msra.gmra.mxu3 %vm137_vm0, %v112_v21  ;;  %v601_v20 = vld [vmem:[#allocation10 + $0x48] sm:$0xff] }
  0x22   :  { %209 = vmatpush.bf16.msrb.mxu3 %v517_v17  ;;  %439 = vmatpush.bf16.msra.mxu0 %v598_v52 }
  0x23   :  { %452 = vmatpush.bf16.msra.mxu1 %v606_v53 }
  0x25   :  { %197 = vmatpush.bf16.msrb.mxu2 %v505_v24  ;;  %v600_v24 = vld [vmem:[#allocation10 + $0x40] sm:$0xff] }
  0x26   :  { %210 = vmatpush.bf16.msrb.mxu3 %v509_v25  ;;  %440 = vmatpush.bf16.msra.mxu0 %v597_v58 }
  0x27   :  { %453 = vmatpush.bf16.msra.mxu1 %v605_v59 }
  0x2a   :  { %441 = vmatpush.bf16.msra.mxu0 %v596_v0 }
  0x2b   :  { %454 = vmatpush.bf16.msra.mxu1 %v604_v1 }
  0x2e   :  { %442 = vmatpush.bf16.msra.mxu0 %v595_v7 }
  0x2f   :  { %455 = vmatpush.bf16.msra.mxu1 %v603_v8 }
  0x30   :  { %518 = vmatmul.msk.bf16.vlgmr.msrb.gmra.mxu2 %vm137_vm0, %v106_v27 }
  0x31   :  { %519 = vmatmul.msk.bf16.vlgmr.msrb.gmra.mxu3 %vm137_vm0, %v106_v27 }
  0x32   :  { %443 = vmatpush.bf16.msra.mxu0 %v594_v13 }
  0x33   :  { %456 = vmatpush.bf16.msra.mxu1 %v602_v14 }
  0x36   :  { %444 = vmatpush.bf16.msra.mxu0 %v593_v19 }
  0x37   :  { %457 = vmatpush.bf16.msra.mxu1 %v601_v20 }
  0x3a   :  { %445 = vmatpush.bf16.msra.mxu0 %v592_v23 }
  0x3b   :  { %458 = vmatpush.bf16.msra.mxu1 %v600_v24 }
  0xa3   :  { %v150_v28 = vpop.f32.mrf.mxu2 }
  0xa4   :  { %v163_v29 = vpop.f32.mrf.mxu3 }
  0xab   :  { %v152_v30 = vpop.f32.mrf.mxu2 }
  0xac   :  { %v165_v31 = vpop.f32.mrf.mxu3 }
  0xb3   :  { %v199_v32 = vpop.f32.mrf.mxu2 }
  0xb4   :  { %v200_v33 = vadd.f32 %v199_v32, %v150_v28  ;;  %v212_v34 = vpop.f32.mrf.mxu3 }
  0xb5   :  { %v213_v35 = vadd.f32 %v212_v34, %v163_v29 }
  0xb6   :  { %v217_v36 = vsel %vm216_vm1, %v200_v33, 0.0 }
  0xb7   :  { %v218_v37 = vrot.slane %v217_v36, 4  ;;  %v224_v38 = vsel %vm216_vm1, %v213_v35, 0.0 }
  0xb8   :  { %v225_v39 = vrot.slane %v224_v38, 4 }
  0xb9   :  { %v219_v40 = vadd.f32 %v218_v37, %v217_v36 }
  0xba   :  { %v226_v41 = vadd.f32 %v225_v39, %v224_v38 }
  0xbb   :  { %v220_v42 = vrot.slane %v219_v40, 2  ;;  %v201_v43 = vpop.f32.mrf.mxu2 }
  0xbc   :  { %v227_v44 = vrot.slane %v226_v41, 2  ;;  %v214_v45 = vpop.f32.mrf.mxu3 }
  0xbd   :  { %v221_v48 = vadd.f32 %v220_v42, %v219_v40  ;;  %v290_v45 = vld [vmem:[%s876_s5] sm:$0x3] }
  0xbe   :  { %v228_v49 = vadd.f32 %v227_v44, %v226_v41  ;;  %v253_v41 = vld [vmem:[%s875_s4] sm:$0x3] }
  0xbf   :  { %v222_v50 = vrot.slane %v221_v48, 1 }
  0xc0   :  { %v229_v51 = vrot.slane %v228_v49, 1 }
  0xc1   :  { %v223_v54 = vadd.f32 %v222_v50, %v221_v48  ;;  %v293_v50 = vperm.slane %v290_v45, 1 }
  0xc2   :  { %v230_v55 = vadd.f32 %v229_v51, %v228_v49  ;;  %v292_v49 = vperm.slane %v290_v45, 0 }
  0xc3   :  { %v231_v56 = vmul.f32 0.16666667, %v223_v54 }
  0xc4   :  { %v232_v57 = vmul.f32 0.16666667, %v230_v55 }
  0xc5   :  { %v847_v60 = vsub.f32 %v200_v33, %v231_v56 }
  0xc6   :  { %v849_v61 = vsub.f32 %v213_v35, %v232_v57 }
  0xc7   :  { %v235_v62 = vmul.f32 %v847_v60, %v847_v60 }
  0xc8   :  { %v236_v63 = vmul.f32 %v849_v61, %v849_v61 }
  0xc9   :  { %v237_v2 = vsel %vm216_vm1, %v235_v62, 0.0 }
  0xca   :  { %v238_v3 = vrot.slane %v237_v2, 4  ;;  %v244_v4 = vsel %vm216_vm1, %v236_v63, 0.0  ;;  %v618_v63 = vld [vmem:[%s878_s7] ss:$0 sm:$0xff] }
  0xcb   :  { %v245_v5 = vrot.slane %v244_v4, 4 }
  0xcc   :  { %v239_v6 = vadd.f32 %v238_v3, %v237_v2 }
  0xcd   :  { %v246_v9 = vadd.f32 %v245_v5, %v244_v4 }
  0xce   :  { %v240_v10 = vrot.slane %v239_v6, 2 }
  0xcf   :  { %v247_v11 = vrot.slane %v246_v9, 2 }
  0xd0   :  { %v241_v12 = vadd.f32 %v240_v10, %v239_v6 }
  0xd1   :  { %v248_v15 = vadd.f32 %v247_v11, %v246_v9 }
  0xd2   :  { %v242_v16 = vrot.slane %v241_v12, 1 }
  0xd3   :  { %v249_v17 = vrot.slane %v248_v15, 1 }
  0xd4   :  { %v243_v18 = vadd.f32 %v242_v16, %v241_v12 }
  0xd5   :  { %v250_v21 = vadd.f32 %v249_v17, %v248_v15 }
  0xd6   :  { %v251_v22 = vmul.f32 0.16666667, %v243_v18 }
  0xd7   :  { %v252_v25 = vmul.f32 0.16666667, %v250_v21 }
  0xd8   :  { %v254_v26 = vadd.f32 1e-05, %v251_v22 }
  0xd9   :  { %v255_v27 = vadd.f32 1e-05, %v252_v25 }
  0xda   :  { %619 = vrsqrt.f32 %v254_v26  ;;  %vm262_vm6 = vweird.f32 %v254_v26 }
  0xdb   :  { %621 = vrsqrt.f32 %v255_v27  ;;  %vm272_vm4 = vweird.f32 %v255_v27 }
  0xe0   :  { %v620_v28 = vpop.eup %619 }
  0xe1   :  { %v622_v29 = vpop.eup %621  ;;  %v257_v30 = vmul.f32 %v620_v28, %v254_v26  ;;  %vm263_vm3 = vweird.f32 %v620_v28 }
  0xe2   :  { %v267_v31 = vmul.f32 %v622_v29, %v255_v27  ;;  %vm273_vm2 = vweird.f32 %v622_v29  ;;  %vm264_vm8 = vmor %vm262_vm6, %vm263_vm3 }
  0xe3   :  { %v258_v32 = vmul.f32 %v620_v28, %v257_v30  ;;  %vm274_vm5 = vmor %vm272_vm4, %vm273_vm2 }
  0xe4   :  { %v268_v33 = vmul.f32 %v622_v29, %v267_v31 }
  0xe5   :  { %v259_v34 = vmul.f32 0.5, %v258_v32 }
  0xe6   :  { %v269_v35 = vmul.f32 0.5, %v268_v33 }
  0xe7   :  { %v260_v36 = vsub.f32 1.5, %v259_v34 }
  0xe8   :  { %v270_v37 = vsub.f32 1.5, %v269_v35 }
  0xe9   :  { %v261_v38 = vmul.f32 %v620_v28, %v260_v36 }
  0xea   :  { %v271_v39 = vmul.f32 %v622_v29, %v270_v37 }
  0xeb   :  { %v265_v43 = vsel %vm264_vm8, %v620_v28, %v261_v38 }
  0xec   :  { %v275_v40 = vsel %vm274_vm5, %v622_v29, %v271_v39 }
  0xed   :  { %v278_v42 = vrot.slane %v275_v40, 7 }
  0xef   :  { %v280_v44 = vsel %vm279_vm7, %v265_v43, %v278_v42 }
  0xf0   :  { %v282_v46 = vmul.f32 %v280_v44, %v253_v41 }
  0xf2   :  { %v285_v47 = vperm.slane %v282_v46, 1  ;;  %v284_v48 = vperm.slane %v282_v46, 0 }
  0xf4   :  { %v289_v51 = vmul.f32 %v285_v47, %v849_v61  ;;  %v288_v52 = vmul.f32 %v284_v48, %v847_v60 }
  0xf6   :  { %v296_v53 = vadd.f32 %v292_v49, %v288_v52  ;;  %v297_v54 = vadd.f32 %v293_v50, %v289_v51 }
  0xf8   :  { %vm298_vm9 = vcmp.ge.f32.partialorder %v296_v53, 0.0  ;;  %v300_v55 = vmul.f32 0.2, %v296_v53  ;;  %vm299_vm10 = vcmp.ge.f32.partialorder %v297_v54, 0.0  ;;  %v301_v56 = vmul.f32 0.2, %v297_v54 }
  0xfa   :  { %v302_v57 = vsel %vm298_vm9, %v296_v53, %v300_v55  ;;  %v303_v58 = vsel %vm299_vm10, %v297_v54, %v301_v56 }
  0xfb   :  { %v304_v59 = vpack.c.bf16 %v302_v57, %v302_v57  ;;  %v305_v62 = vpack.c.bf16 %v303_v58, %v303_v58 }
  0xfd   :  { %446 = vmatmul.bf16.vlgmr.msra.gmra.mxu0 %v304_v59  ;;  %459 = vmatmul.bf16.vlgmr.msra.gmra.mxu1 %v305_v62 }
 0x17a   :  { %v447_v0 = vpop.f32.mrf.mxu0  ;;  %v460_v61 = vpop.f32.mrf.mxu1 }
 0x17b   :  { %v448_v60 = vadd.f32 %v618_v63, %v447_v0 }
 0x17d   :  { %v461_v1 = vadd.f32 %v460_v61, %v448_v60 }
 0x17f   :  { %464 = vst [vmem:[#allocation11] sm:$0x3f] %v461_v1 }
 0x180   :  { %475 = dma.vmem_to_hbm [thread:$0]  %s471_s12, 128, %s473_s15, [#allocation4]  }
 0x182   :  { %v449_v2 = vpop.f32.mrf.mxu0  ;;  %v462_v3 = vpop.f32.mrf.mxu1 }
 0x183   :  { %773 = dma.done.wait [#allocation4], 128  }
 0x184   :  { %774 = vsyncadd [#allocation4], 4294967168 }
 0x185   :  { %480 = vsyncpa [#allocation3], 1 }
 0x186   :  { %481 = vsyncpa [#allocation6], 1 }
 0x187   :  { %482 = vsyncpa [#allocation9], 1 }
 0x188   :  { %483 = vsyncpa [#allocation4], 1 }

</bundles_post_ra>
